<compile_context>
chip_gen: v5e
topology: v5e:2x2
jax: 0.10.0
libtpu: 0.0.40
codegen_flags: <defaults>
</compile_context>

<pallas_src>
import jax
import jax.numpy as jnp
from jax.experimental import pallas as pl
from jax.experimental.pallas import tpu as pltpu

# ---------------- synthetic config (small, consistent with the module) ----------------
IMAGE_SIZE = (64, 64)          # cfg.NETWORK.IMAGE_SIZE  (w_img, h_img)
HEATMAP_SIZE = (16, 16)        # cfg.NETWORK.HEATMAP_SIZE (w, h)
ORI_IMAGE_SIZE = (128, 128)    # cfg.NETWORK.ORI_IMAGE_SIZE
SPACE_SIZE = (2000.0, 2000.0, 2000.0)   # cfg.MULTI_PERSON.SPACE_SIZE
SPACE_CENTER = (0.0, 0.0, 1000.0)       # cfg.MULTI_PERSON.SPACE_CENTER
VOXELS_PER_AXIS = (8, 8, 4)             # cfg.MULTI_PERSON.INITIAL_CUBE_SIZE

BATCH = 2
N_CAM = 3
NUM_JOINTS = 8

W = HEATMAP_SIZE[0]
H = HEATMAP_SIZE[1]
HW = H * W
NBINS = VOXELS_PER_AXIS[0] * VOXELS_PER_AXIS[1] * VOXELS_PER_AXIS[2]   # 256
K_DIM = N_CAM * HW                                                      # 768
M_DIM = BATCH * NUM_JOINTS                                              # 16


# ---------------- glue: grid construction & camera projection (cached part) ----------------
def compute_grid(box_size, box_center, n_bins):
    g1x = jnp.linspace(-box_size[0] / 2, box_size[0] / 2, n_bins[0]) + box_center[0]
    g1y = jnp.linspace(-box_size[1] / 2, box_size[1] / 2, n_bins[1]) + box_center[1]
    g1z = jnp.linspace(-box_size[2] / 2, box_size[2] / 2, n_bins[2]) + box_center[2]
    gx, gy, gz = jnp.meshgrid(g1x, g1y, g1z, indexing="ij")   # torch.meshgrid default = 'ij'
    return jnp.stack([gx.reshape(-1), gy.reshape(-1), gz.reshape(-1)], axis=1).astype(jnp.float32)


def project_pose_pinhole(points, cam):
    # TODO(synk): original project_pose (external lib) also models lens distortion (k, p);
    # only the pinhole part is reproduced here.
    xcam = (points - cam["T"][None, :]) @ cam["R"].T          # (nbins, 3)
    xy = xcam[:, :2] / xcam[:, 2:3]
    return xy * cam["f"][None, :] + cam["c"][None, :]


def do_transform(xy, trans):
    aug = jnp.concatenate([xy, jnp.ones((xy.shape[0], 1), xy.dtype)], axis=1)
    return aug @ trans.T                                       # trans: (2, 3)


def project_grid(grid3d, cam, w, h, resize_transform):
    xy = project_pose_pinhole(grid3d, cam)
    xy = jnp.clip(xy, -1.0, float(max(ORI_IMAGE_SIZE)))
    xy = do_transform(xy, resize_transform)
    xy = xy * jnp.array([w, h], jnp.float32) / jnp.array(IMAGE_SIZE, jnp.float32)
    sg = xy / jnp.array([w - 1, h - 1], jnp.float32) * 2.0 - 1.0
    return jnp.clip(sg, -1.1, 1.1)                             # (nbins, 2), normalized coords


# ---------------- glue: precomputed bilinear interpolation matrix (cacheable) -------------
def build_interp_matrix(sample_grids):
    """sample_grids: (N_CAM, NBINS, 2) normalized coords in [-1.1, 1.1], shared per sequence.

    Returns (N_CAM*HW, NBINS) f32 matrix W such that for heatmaps folded to
    (B*J, N_CAM*HW) the product hm @ W equals mean_over_cameras(grid_sample(hm)),
    i.e. bilinear weights * zero-padding validity mask * 1/N_CAM.
    This is the per-sequence cacheable part (analogous to self.sample_grid[seq]):
    computed once per sequence, reused for every forward / every batch item.
    """
    gx = sample_grids[..., 0]                                  # (n, NBINS)
    gy = sample_grids[..., 1]
    # align_corners=True mapping to pixel coordinates
    x = (gx + 1.0) * 0.5 * (W - 1)
    y = (gy + 1.0) * 0.5 * (H - 1)
    x0f = jnp.floor(x)
    y0f = jnp.floor(y)
    wx1 = x - x0f
    wx0 = 1.0 - wx1
    wy1 = y - y0f
    wy0 = 1.0 - wy1
    x0 = x0f.astype(jnp.int32)
    y0 = y0f.astype(jnp.int32)
    x1 = x0 + 1
    y1 = y0 + 1
    pix = jnp.arange(HW, dtype=jnp.int32)                      # (HW,)

    def corner(xi, yi, wv):
        # zero padding: out-of-bounds corners contribute nothing (mask stays multiplied
        # into the selected weight -- OOB linear indices would otherwise alias pixels).
        valid = (xi >= 0) & (xi < W) & (yi >= 0) & (yi < H)
        idx = yi * W + xi                                      # (n, NBINS)
        onehot = (idx[:, None, :] == pix[None, :, None]).astype(jnp.float32)   # (n, HW, NBINS)
        return onehot * jnp.where(valid, wv, 0.0)[:, None, :]

    wmat = (corner(x0, y0, wx0 * wy0) + corner(x1, y0, wx1 * wy0)
            + corner(x0, y1, wx0 * wy1) + corner(x1, y1, wx1 * wy1))
    wmat = wmat * (1.0 / N_CAM)                                # fold camera mean into weights
    return wmat.reshape(K_DIM, NBINS)                          # keep f32 (1e-4 accuracy check)


# ---------------- Pallas kernel: single MXU contraction + clamp ----------------
def project_kernel(hm_ref, w_ref, out_ref):
    # hm_ref: (M_DIM, K_DIM) ; w_ref: (K_DIM, NBINS) ; out_ref: (M_DIM, NBINS)
    acc = jnp.dot(hm_ref[...], w_ref[...], preferred_element_type=jnp.float32)
    out_ref[...] = jnp.clip(acc, 0.0, 1.0)                     # cubes.clamp(0, 1)


def project_pallas(hm_cat, wmat):
    # hm_cat: (M_DIM, K_DIM) f32 ; wmat: (K_DIM, NBINS) f32  (shared across batch)
    cost = pl.CostEstimate(
        flops=2 * M_DIM * K_DIM * NBINS,
        transcendentals=0,
        bytes_accessed=(M_DIM * K_DIM + K_DIM * NBINS + M_DIM * NBINS) * 4,
    )
    return pl.pallas_call(
        project_kernel,
        out_shape=jax.ShapeDtypeStruct((M_DIM, NBINS), jnp.float32),
        grid_spec=pltpu.PrefetchScalarGridSpec(
            num_scalar_prefetch=0,
            grid=(1,),                                         # whole problem = one MXU matmul
            in_specs=[
                pl.BlockSpec((M_DIM, K_DIM), lambda i: (0, 0)),
                pl.BlockSpec((K_DIM, NBINS), lambda i: (0, 0)),
            ],
            out_specs=pl.BlockSpec((M_DIM, NBINS), lambda i: (0, 0)),
        ),
        compiler_params=pltpu.CompilerParams(
            dimension_semantics=("arbitrary",)),
        cost_estimate=cost,
    )(hm_cat, wmat)


def project_layer_forward(heatmaps_list, wmat):
    """Mirrors ProjectLayer.forward given the already-cached interp matrix.

    heatmaps_list: list of N_CAM arrays, each (B, J, H, W)  (PyTorch NCHW)
    wmat:          (N_CAM*HW, NBINS) cached per-sequence interpolation matrix
    returns cubes: (B, J, vx, vy, vz)
    """
    hm = jnp.stack(heatmaps_list, axis=1)                        # torch.stack(heatmaps, dim=1)
    # fold batch*joints into M and cameras*pixels into K: K index = cam*HW + y*W + x
    hm_cat = hm.transpose(0, 2, 1, 3, 4).reshape(M_DIM, K_DIM)
    cubes = project_pallas(hm_cat, wmat)                         # (B*J, NBINS), already clamped
    return cubes.reshape(BATCH, NUM_JOINTS, *VOXELS_PER_AXIS)


# ---------------- pure-JAX reference (gather-based grid_sample) for verification ----------------
def ref_project(hm_flat, gx, gy):
    # hm_flat: (B, n, J, HW) ; gx, gy: (B, n, NBINS)
    x = (gx + 1.0) * 0.5 * (W - 1)
    y = (gy + 1.0) * 0.5 * (H - 1)
    x0f = jnp.floor(x)
    y0f = jnp.floor(y)
    wx1 = x - x0f
    wx0 = 1.0 - wx1
    wy1 = y - y0f
    wy0 = 1.0 - wy1
    x0 = x0f.astype(jnp.int32)
    y0 = y0f.astype(jnp.int32)
    x1 = x0 + 1
    y1 = y0 + 1

    def corner(xi, yi, wv):
        valid = (xi >= 0) & (xi < W) & (yi >= 0) & (yi < H)
        idx = jnp.clip(yi, 0, H - 1) * W + jnp.clip(xi, 0, W - 1)
        idx_b = jnp.broadcast_to(idx[:, :, None, :], (BATCH, N_CAM, NUM_JOINTS, NBINS))
        vals = jnp.take_along_axis(hm_flat, idx_b, axis=-1)
        return vals * jnp.where(valid, wv, 0.0)[:, :, None, :]

    sampled = (corner(x0, y0, wx0 * wy0) + corner(x1, y0, wx1 * wy0)
               + corner(x0, y1, wx0 * wy1) + corner(x1, y1, wx1 * wy1))
    cubes = jnp.clip(jnp.mean(sampled, axis=1), 0.0, 1.0)
    return cubes.reshape(BATCH, NUM_JOINTS, *VOXELS_PER_AXIS)


# ---------------- deterministic synthetic cameras ----------------
def make_cameras(n):
    cams = []
    for c in range(n):
        theta = 0.2 * (c - 1)                                    # small yaw around z
        ct, st = float(jnp.cos(theta)), float(jnp.sin(theta))
        R = jnp.array([[ct, -st, 0.0], [st, ct, 0.0], [0.0, 0.0, 1.0]], jnp.float32)
        T = jnp.array([300.0 * (c - 1), -200.0 * (c - 1), -4000.0], jnp.float32)
        f = jnp.array([220.0 + 10.0 * c, 220.0 + 10.0 * c], jnp.float32)
        cc = jnp.array([ORI_IMAGE_SIZE[0] / 2.0, ORI_IMAGE_SIZE[1] / 2.0], jnp.float32)
        cams.append(dict(R=R, T=T, f=f, c=cc))
    return cams


if __name__ == "__main__":
    key = jax.random.PRNGKey(0)
    keys = jax.random.split(key, N_CAM)
    # heatmaps in [0, 1], one NCHW tensor per camera view (as passed to forward as a list)
    heatmaps_list = [jax.random.uniform(k, (BATCH, NUM_JOINTS, H, W), jnp.float32) for k in keys]

    grid3d = compute_grid(SPACE_SIZE, SPACE_CENTER, VOXELS_PER_AXIS)   # (NBINS, 3)
    resize_transform = jnp.array(
        [[IMAGE_SIZE[0] / ORI_IMAGE_SIZE[0], 0.0, 0.0],
         [0.0, IMAGE_SIZE[1] / ORI_IMAGE_SIZE[1], 0.0]], jnp.float32)
    cams = make_cameras(N_CAM)

    # Per-sequence cache in the original module -> computed ONCE here (all batch items
    # belong to the same sequence, so they share the sample grid & the interp matrix).
    # NOTE: self.sample_grid_img (image-resolution grids) is cached but unused in forward's output.
    sample_grids = jnp.stack(
        [project_grid(grid3d, cam, W, H, resize_transform) for cam in cams], axis=0
    )                                                            # (N_CAM, NBINS, 2)
    wmat = jax.block_until_ready(build_interp_matrix(sample_grids))   # cached per sequence

    cubes = jax.block_until_ready(project_layer_forward(heatmaps_list, wmat))

    # verify against a pure-JAX gather-based reference
    hm_flat = jnp.stack(heatmaps_list, axis=1).reshape(BATCH, N_CAM, NUM_JOINTS, HW)
    sg_b = jnp.broadcast_to(sample_grids[None], (BATCH, N_CAM, NBINS, 2))
    ref = ref_project(hm_flat, sg_b[..., 0], sg_b[..., 1])
    assert cubes.shape == (BATCH, NUM_JOINTS, *VOXELS_PER_AXIS), cubes.shape
    err = float(jnp.max(jnp.abs(cubes - ref)))
    if err > 1e-4:
        raise AssertionError(f"kernel/reference mismatch, max abs err = {err}")
    print("KERNEL_OK")
</pallas_src>

<mosaic_0001>
module attributes {stable_mosaic.version = 11 : i64} {
  func.func @project_kernel(%arg0: i32, %arg1: memref<16x768xf32, #tpu.memory_space<vmem>>, %arg2: memref<768x256xf32, #tpu.memory_space<vmem>>, %arg3: memref<16x256xf32, #tpu.memory_space<vmem>>) attributes {dimension_semantics = [#tpu.dimension_semantics<arbitrary>], iteration_bounds = array<i64: 1>, scalar_prefetch = 0 : i64, scratch_operands = 0 : i64, tpu.core_type = #tpu.core_type<tc>, window_params = [{pipeline_mode = #tpu.pipeline_mode<synchronous>, transform_indices = @transform_0, window_bounds = array<i64: 16, 768>}, {pipeline_mode = #tpu.pipeline_mode<synchronous>, transform_indices = @transform_1, window_bounds = array<i64: 768, 256>}, {pipeline_mode = #tpu.pipeline_mode<synchronous>, transform_indices = @transform_2, window_bounds = array<i64: 16, 256>}]} {
    %c0 = arith.constant 0 : index
    %c0_0 = arith.constant 0 : index
    %0 = vector.load %arg1[%c0, %c0_0] : memref<16x768xf32, #tpu.memory_space<vmem>>, vector<16x768xf32>
    %c0_1 = arith.constant 0 : index
    %c0_2 = arith.constant 0 : index
    %1 = vector.load %arg2[%c0_1, %c0_2] : memref<768x256xf32, #tpu.memory_space<vmem>>, vector<768x256xf32>
    %cst = arith.constant dense<0.000000e+00> : vector<16x256xf32>
    %2 = tpu.matmul %0, %1, %cst {dimension_numbers = #tpu.dot_dimension_numbers<[1], [0], [0], [1], [0, 0, 1, 1], [], []>} : vector<16x768xf32>, vector<768x256xf32>, vector<16x256xf32> -> vector<16x256xf32>
    %cst_3 = arith.constant 0.000000e+00 : f32
    %cst_4 = arith.constant 1.000000e+00 : f32
    %3 = vector.broadcast %cst_3 : f32 to vector<16x256xf32>
    %4 = arith.maximumf %3, %2 : vector<16x256xf32>
    %5 = vector.broadcast %cst_4 : f32 to vector<16x256xf32>
    %6 = arith.minimumf %5, %4 : vector<16x256xf32>
    %c0_5 = arith.constant 0 : index
    %c0_6 = arith.constant 0 : index
    %7 = vector.load %arg3[%c0_5, %c0_6] : memref<16x256xf32, #tpu.memory_space<vmem>>, vector<16x256xf32>
    tpu.vector_store %arg3[%c0_5, %c0_6], %6 {strides = array<i32>} : memref<16x256xf32, #tpu.memory_space<vmem>>, vector<16x256xf32>,
    return
  }
  func.func @transform_0(%arg0: i32) -> (i32, i32) {
    %c0_i32 = arith.constant 0 : i32
    %c0_i32_0 = arith.constant 0 : i32
    %c0_i32_1 = arith.constant 0 : i32
    return %c0_i32, %c0_i32_0 : i32, i32
  }
  func.func @transform_1(%arg0: i32) -> (i32, i32) {
    %c0_i32 = arith.constant 0 : i32
    %c0_i32_0 = arith.constant 0 : i32
    %c0_i32_1 = arith.constant 0 : i32
    return %c0_i32, %c0_i32_0 : i32, i32
  }
  func.func @transform_2(%arg0: i32) -> (i32, i32) {
    %c0_i32 = arith.constant 0 : i32
    %c0_i32_0 = arith.constant 0 : i32
    %c0_i32_1 = arith.constant 0 : i32
    return %c0_i32, %c0_i32_0 : i32, i32
  }
}

</mosaic_0001>

<bundles_post_ra>
// kernel: tpu_custom_call.1
= control target key start
LH: loop header
LB: loop body
LE: loop exit
PB: predicated region body
PF: predicated region fallthrough
CT: control target
= control target key end

     0   :  { %7 = vsyncpa [#allocation3], 0  ;;  %s726_s0 = inlined_call_operand.hbm [shape: f32[16,768], index: 0, kind: input, shape index: {}]   ;;  %s727_s1 = inlined_call_operand.hbm [shape: f32[768,256], index: 1, kind: input, shape index: {}]   ;;  %s728_s2 = inlined_call_operand.hbm [shape: f32[16,256], index: 2, kind: output, shape index: {}]  }
   0x1   :  { %8 = vsyncpa [#allocation6], 0 }
   0x2   :  { %9 = vsyncpa [#allocation4], 0  ;;  %s14_s11 = sshll.u32 %s726_s0, 4  ;;  %s641_s12 = smov [#allocation2]   ;;  %s15_s11 = int_to_ptr.hbm [resolvable:$true] %s14_s11 }
   0x3   :  { %s16_s13 = sshll.u32 %s641_s12, 4  ;;  %s27_s16 = sshll.u32 %s727_s1, 4  ;;  %s17_s13 = int_to_ptr.vmem [resolvable:$true] %s16_s13  ;;  %s28_s16 = int_to_ptr.hbm [resolvable:$true] %s27_s16 }
   0x4   :  { %s642_s17 = smov 768   ;;  %s643_s18 = smov 48  }
   0x5   :  { %22 = dma.hbm_to_vmem [thread:$0]  %s15_s11, 1536, %s17_s13, [#allocation3], %s642_s17, %s642_s17, %s643_s18  }
   0x6   :  { %s644_s19 = smov [#allocation5]   ;;  %s645_s21 = smov 256  }
   0x7   :  { %s29_s20 = sshll.u32 %s644_s19, 4  ;;  %s646_s22 = smov 16   ;;  %s30_s20 = int_to_ptr.vmem [resolvable:$true] %s29_s20 }
   0x8   :  { %35 = dma.hbm_to_vmem [thread:$0]  %s28_s16, 24576, %s30_s20, [#allocation6], %s645_s21, %s645_s21, %s646_s22  }
   0x9   :  { %635 = dma.done.wait [#allocation3], 1536  }
   0xa   :  { %636 = vsyncadd [#allocation3], 4294965760 }
   0xb   :  { %637 = dma.done.wait [#allocation6], 24576  }
   0xc   :  { %638 = vsyncadd [#allocation6], 4294942720  ;;  %v86_v0 = vld [vmem:[#allocation5 + $0xf0] sm:$0xff]  ;;  %v84_v2 = vld [vmem:[#allocation5 + $0xe0] sm:$0xff]  ;;  %s647_s0 = smov [#allocation7]   ;;  %s542_s25 = sshll.u32 %s728_s2, 4  ;;  %s543_s25 = int_to_ptr.hbm [resolvable:$true] %s542_s25 }
   0xd   :  { %v150_v1 = vld [vmem:[#allocation5 + $0x2f0] sm:$0xff]  ;;  %248 = vmatpush.msra.mxu0 %v86_v0  ;;  %v148_v4 = vld [vmem:[#allocation5 + $0x2e0] sm:$0xff]  ;;  %v87_v63 = vld [vmem:[#allocation5 + $0xf8] sm:$0xff]  ;;  %s540_s1 = sshll.u32 %s647_s0, 4  ;;  %s541_s1 = int_to_ptr.vmem [resolvable:$true] %s540_s1 }
   0xe   :  { %294 = vmatpush.msra.mxu2 %v150_v1  ;;  %v118_v3 = vld [vmem:[#allocation5 + $0x1f0] sm:$0xff]  ;;  %v116_v7 = vld [vmem:[#allocation5 + $0x1e0] sm:$0xff] }
   0xf   :  { %v182_v5 = vld [vmem:[#allocation5 + $0x3f0] sm:$0xff]  ;;  %271 = vmatpush.msra.mxu1 %v118_v3  ;;  %249 = vmatpush.msra.mxu0 %v84_v2  ;;  %v180_v9 = vld [vmem:[#allocation5 + $0x3e0] sm:$0xff] }
  0x10   :  { %317 = vmatpush.msra.mxu3 %v182_v5  ;;  %v82_v6 = vld [vmem:[#allocation5 + $0xd0] sm:$0xff]  ;;  %295 = vmatpush.msra.mxu2 %v148_v4  ;;  %v80_v11 = vld [vmem:[#allocation5 + $0xc0] sm:$0xff]  ;;  %v85_v4 = vld [vmem:[#allocation5 + $0xe8] sm:$0xff] }
  0x11   :  { %v146_v8 = vld [vmem:[#allocation5 + $0x2d0] sm:$0xff]  ;;  %272 = vmatpush.msra.mxu1 %v116_v7  ;;  %v144_v12 = vld [vmem:[#allocation5 + $0x2c0] sm:$0xff]  ;;  %250 = vmatpush.msra.mxu0 %v82_v6  ;;  %v119_v5 = vld [vmem:[#allocation5 + $0x1f8] sm:$0xff] }
  0x12   :  { %v114_v10 = vld [vmem:[#allocation5 + $0x1d0] sm:$0xff]  ;;  %318 = vmatpush.msra.mxu3 %v180_v9  ;;  %296 = vmatpush.msra.mxu2 %v146_v8  ;;  %v112_v14 = vld [vmem:[#allocation5 + $0x1c0] sm:$0xff]  ;;  %v83_v8 = vld [vmem:[#allocation5 + $0xd8] sm:$0xff] }
  0x13   :  { %v178_v13 = vld [vmem:[#allocation5 + $0x3d0] sm:$0xff]  ;;  %v176_v15 = vld [vmem:[#allocation5 + $0x3c0] sm:$0xff]  ;;  %273 = vmatpush.msra.mxu1 %v114_v10  ;;  %251 = vmatpush.msra.mxu0 %v80_v11  ;;  %v117_v9 = vld [vmem:[#allocation5 + $0x1e8] sm:$0xff] }
  0x14   :  { %319 = vmatpush.msra.mxu3 %v178_v13  ;;  %v78_v16 = vld [vmem:[#allocation5 + $0xb0] sm:$0xff]  ;;  %297 = vmatpush.msra.mxu2 %v144_v12  ;;  %v76_v20 = vld [vmem:[#allocation5 + $0xa0] sm:$0xff]  ;;  %v81_v12 = vld [vmem:[#allocation5 + $0xc8] sm:$0xff] }
  0x15   :  { %v142_v17 = vld [vmem:[#allocation5 + $0x2b0] sm:$0xff]  ;;  %274 = vmatpush.msra.mxu1 %v112_v14  ;;  %v140_v21 = vld [vmem:[#allocation5 + $0x2a0] sm:$0xff]  ;;  %252 = vmatpush.msra.mxu0 %v78_v16  ;;  %v115_v13 = vld [vmem:[#allocation5 + $0x1d8] sm:$0xff] }
  0x16   :  { %v110_v18 = vld [vmem:[#allocation5 + $0x1b0] sm:$0xff]  ;;  %320 = vmatpush.msra.mxu3 %v176_v15  ;;  %298 = vmatpush.msra.mxu2 %v142_v17  ;;  %v108_v22 = vld [vmem:[#allocation5 + $0x1a0] sm:$0xff]  ;;  %v79_v16 = vld [vmem:[#allocation5 + $0xb8] sm:$0xff] }
  0x17   :  { %v174_v19 = vld [vmem:[#allocation5 + $0x3b0] sm:$0xff]  ;;  %v172_v23 = vld [vmem:[#allocation5 + $0x3a0] sm:$0xff]  ;;  %275 = vmatpush.msra.mxu1 %v110_v18  ;;  %253 = vmatpush.msra.mxu0 %v76_v20  ;;  %v113_v17 = vld [vmem:[#allocation5 + $0x1c8] sm:$0xff] }
  0x18   :  { %321 = vmatpush.msra.mxu3 %v174_v19  ;;  %v74_v24 = vld [vmem:[#allocation5 + $0x90] sm:$0xff]  ;;  %299 = vmatpush.msra.mxu2 %v140_v21  ;;  %v72_v28 = vld [vmem:[#allocation5 + $0x80] sm:$0xff]  ;;  %v77_v20 = vld [vmem:[#allocation5 + $0xa8] sm:$0xff] }
  0x19   :  { %v138_v25 = vld [vmem:[#allocation5 + $0x290] sm:$0xff]  ;;  %276 = vmatpush.msra.mxu1 %v108_v22  ;;  %v136_v29 = vld [vmem:[#allocation5 + $0x280] sm:$0xff]  ;;  %254 = vmatpush.msra.mxu0 %v74_v24  ;;  %v111_v21 = vld [vmem:[#allocation5 + $0x1b8] sm:$0xff] }
  0x1a   :  { %v106_v26 = vld [vmem:[#allocation5 + $0x190] sm:$0xff]  ;;  %322 = vmatpush.msra.mxu3 %v172_v23  ;;  %300 = vmatpush.msra.mxu2 %v138_v25  ;;  %v104_v30 = vld [vmem:[#allocation5 + $0x180] sm:$0xff]  ;;  %v75_v24 = vld [vmem:[#allocation5 + $0x98] sm:$0xff] }
  0x1b   :  { %v170_v27 = vld [vmem:[#allocation5 + $0x390] sm:$0xff]  ;;  %v168_v31 = vld [vmem:[#allocation5 + $0x380] sm:$0xff]  ;;  %277 = vmatpush.msra.mxu1 %v106_v26  ;;  %255 = vmatpush.msra.mxu0 %v72_v28  ;;  %v109_v25 = vld [vmem:[#allocation5 + $0x1a8] sm:$0xff] }
  0x1c   :  { %323 = vmatpush.msra.mxu3 %v170_v27  ;;  %v70_v32 = vld [vmem:[#allocation5 + $0x70] sm:$0xff]  ;;  %301 = vmatpush.msra.mxu2 %v136_v29  ;;  %v68_v36 = vld [vmem:[#allocation5 + $0x60] sm:$0xff]  ;;  %v73_v28 = vld [vmem:[#allocation5 + $0x88] sm:$0xff] }
  0x1d   :  { %v134_v33 = vld [vmem:[#allocation5 + $0x270] sm:$0xff]  ;;  %278 = vmatpush.msra.mxu1 %v104_v30  ;;  %v132_v37 = vld [vmem:[#allocation5 + $0x260] sm:$0xff]  ;;  %256 = vmatpush.msra.mxu0 %v70_v32  ;;  %v107_v29 = vld [vmem:[#allocation5 + $0x198] sm:$0xff] }
  0x1e   :  { %v102_v34 = vld [vmem:[#allocation5 + $0x170] sm:$0xff]  ;;  %324 = vmatpush.msra.mxu3 %v168_v31  ;;  %302 = vmatpush.msra.mxu2 %v134_v33  ;;  %v100_v38 = vld [vmem:[#allocation5 + $0x160] sm:$0xff]  ;;  %v71_v32 = vld [vmem:[#allocation5 + $0x78] sm:$0xff] }
  0x1f   :  { %v166_v35 = vld [vmem:[#allocation5 + $0x370] sm:$0xff]  ;;  %v164_v39 = vld [vmem:[#allocation5 + $0x360] sm:$0xff]  ;;  %279 = vmatpush.msra.mxu1 %v102_v34  ;;  %257 = vmatpush.msra.mxu0 %v68_v36  ;;  %v105_v33 = vld [vmem:[#allocation5 + $0x188] sm:$0xff] }
  0x20   :  { %325 = vmatpush.msra.mxu3 %v166_v35  ;;  %v66_v40 = vld [vmem:[#allocation5 + $0x50] sm:$0xff]  ;;  %303 = vmatpush.msra.mxu2 %v132_v37  ;;  %v64_v44 = vld [vmem:[#allocation5 + $0x40] sm:$0xff]  ;;  %v69_v36 = vld [vmem:[#allocation5 + $0x68] sm:$0xff] }
  0x21   :  { %v130_v41 = vld [vmem:[#allocation5 + $0x250] sm:$0xff]  ;;  %280 = vmatpush.msra.mxu1 %v100_v38  ;;  %v128_v45 = vld [vmem:[#allocation5 + $0x240] sm:$0xff]  ;;  %258 = vmatpush.msra.mxu0 %v66_v40  ;;  %v103_v37 = vld [vmem:[#allocation5 + $0x178] sm:$0xff] }
  0x22   :  { %v98_v42 = vld [vmem:[#allocation5 + $0x150] sm:$0xff]  ;;  %326 = vmatpush.msra.mxu3 %v164_v39  ;;  %304 = vmatpush.msra.mxu2 %v130_v41  ;;  %v96_v46 = vld [vmem:[#allocation5 + $0x140] sm:$0xff]  ;;  %v67_v40 = vld [vmem:[#allocation5 + $0x58] sm:$0xff] }
  0x23   :  { %v162_v43 = vld [vmem:[#allocation5 + $0x350] sm:$0xff]  ;;  %v160_v47 = vld [vmem:[#allocation5 + $0x340] sm:$0xff]  ;;  %281 = vmatpush.msra.mxu1 %v98_v42  ;;  %259 = vmatpush.msra.mxu0 %v64_v44  ;;  %v101_v41 = vld [vmem:[#allocation5 + $0x168] sm:$0xff] }
  0x24   :  { %327 = vmatpush.msra.mxu3 %v162_v43  ;;  %v62_v48 = vld [vmem:[#allocation5 + $0x30] sm:$0xff]  ;;  %305 = vmatpush.msra.mxu2 %v128_v45  ;;  %v60_v52 = vld [vmem:[#allocation5 + $0x20] sm:$0xff]  ;;  %v65_v45 = vld [vmem:[#allocation5 + $0x48] sm:$0xff] }
  0x25   :  { %v126_v49 = vld [vmem:[#allocation5 + $0x230] sm:$0xff]  ;;  %282 = vmatpush.msra.mxu1 %v96_v46  ;;  %v124_v53 = vld [vmem:[#allocation5 + $0x220] sm:$0xff]  ;;  %260 = vmatpush.msra.mxu0 %v62_v48  ;;  %v99_v46 = vld [vmem:[#allocation5 + $0x158] sm:$0xff] }
  0x26   :  { %v94_v50 = vld [vmem:[#allocation5 + $0x130] sm:$0xff]  ;;  %328 = vmatpush.msra.mxu3 %v160_v47  ;;  %306 = vmatpush.msra.mxu2 %v126_v49  ;;  %v92_v54 = vld [vmem:[#allocation5 + $0x120] sm:$0xff]  ;;  %v674_v47 = vld [vmem:[#allocation2 + $0x8] sm:$0xff] }
  0x27   :  { %v158_v51 = vld [vmem:[#allocation5 + $0x330] sm:$0xff]  ;;  %v156_v55 = vld [vmem:[#allocation5 + $0x320] sm:$0xff]  ;;  %283 = vmatpush.msra.mxu1 %v94_v50  ;;  %261 = vmatpush.msra.mxu0 %v60_v52  ;;  %v63_v50 = vld [vmem:[#allocation5 + $0x38] sm:$0xff] }
  0x28   :  { %329 = vmatpush.msra.mxu3 %v158_v51  ;;  %v58_v56 = vld [vmem:[#allocation5 + $0x10] sm:$0xff]  ;;  %307 = vmatpush.msra.mxu2 %v124_v53  ;;  %v56_v60 = vld [vmem:[#allocation5] sm:$0xff]  ;;  %v97_v51 = vld [vmem:[#allocation5 + $0x148] sm:$0xff] }
  0x29   :  { %v122_v57 = vld [vmem:[#allocation5 + $0x210] sm:$0xff]  ;;  %284 = vmatpush.msra.mxu1 %v92_v54  ;;  %v120_v61 = vld [vmem:[#allocation5 + $0x200] sm:$0xff]  ;;  %262 = vmatpush.msra.mxu0 %v58_v56  ;;  %v61_v54 = vld [vmem:[#allocation5 + $0x28] sm:$0xff] }
  0x2a   :  { %v90_v58 = vld [vmem:[#allocation5 + $0x110] sm:$0xff]  ;;  %330 = vmatpush.msra.mxu3 %v156_v55  ;;  %308 = vmatpush.msra.mxu2 %v122_v57  ;;  %v88_v0 = vld [vmem:[#allocation5 + $0x100] sm:$0xff]  ;;  %v95_v55 = vld [vmem:[#allocation5 + $0x138] sm:$0xff] }
  0x2b   :  { %v154_v59 = vld [vmem:[#allocation5 + $0x310] sm:$0xff]  ;;  %285 = vmatpush.msra.mxu1 %v90_v58  ;;  %v152_v1 = vld [vmem:[#allocation5 + $0x300] sm:$0xff]  ;;  %263 = vmatpush.msra.mxu0 %v56_v60  ;;  %v93_v60 = vld [vmem:[#allocation5 + $0x128] sm:$0xff] }
  0x2c   :  { %v214_v62 = vld [vmem:[#allocation5 + $0x4f0] sm:$0xff]  ;;  %331 = vmatpush.msra.mxu3 %v154_v59  ;;  %309 = vmatpush.msra.mxu2 %v120_v61  ;;  %v212_v2 = vld [vmem:[#allocation5 + $0x4e0] sm:$0xff]  ;;  %v59_v59 = vld [vmem:[#allocation5 + $0x18] sm:$0xff] }
  0x2d   :  { %v246_v3 = vld [vmem:[#allocation5 + $0x5f0] sm:$0xff]  ;;  %340 = vmatpush.msrb.mxu0 %v214_v62  ;;  %286 = vmatpush.msra.mxu1 %v88_v0  ;;  %v244_v7 = vld [vmem:[#allocation5 + $0x5e0] sm:$0xff]  ;;  %v683_v62 = vld [vmem:[#allocation2 + $0x18] sm:$0xff] }
  0x2e   :  { %386 = vmatpush.msrb.mxu2 %v87_v63  ;;  %332 = vmatpush.msra.mxu3 %v152_v1  ;;  %v210_v6 = vld [vmem:[#allocation5 + $0x4d0] sm:$0xff]  ;;  %v208_v10 = vld [vmem:[#allocation5 + $0x4c0] sm:$0xff]  ;;  %v57_v1 = vld [vmem:[#allocation5 + $0x8] sm:$0xff] }
  0x2f   :  { %341 = vmatpush.msrb.mxu0 %v212_v2  ;;  %363 = vmatpush.msrb.mxu1 %v246_v3  ;;  %v242_v11 = vld [vmem:[#allocation5 + $0x5d0] sm:$0xff]  ;;  %v240_v15 = vld [vmem:[#allocation5 + $0x5c0] sm:$0xff]  ;;  %v91_v2 = vld [vmem:[#allocation5 + $0x118] sm:$0xff] }
  0x30   :  { %387 = vmatpush.msrb.mxu2 %v85_v4  ;;  %409 = vmatpush.msrb.mxu3 %v119_v5  ;;  %v206_v14 = vld [vmem:[#allocation5 + $0x4b0] sm:$0xff]  ;;  %v204_v18 = vld [vmem:[#allocation5 + $0x4a0] sm:$0xff]  ;;  %v151_v3 = vld [vmem:[#allocation5 + $0x2f8] sm:$0xff] }
  0x31   :  { %342 = vmatpush.msrb.mxu0 %v210_v6  ;;  %364 = vmatpush.msrb.mxu1 %v244_v7  ;;  %v238_v19 = vld [vmem:[#allocation5 + $0x5b0] sm:$0xff]  ;;  %v236_v23 = vld [vmem:[#allocation5 + $0x5a0] sm:$0xff]  ;;  %v215_v4 = vld [vmem:[#allocation5 + $0x4f8] sm:$0xff] }
  0x32   :  { %388 = vmatpush.msrb.mxu2 %v83_v8  ;;  %410 = vmatpush.msrb.mxu3 %v117_v9  ;;  %v202_v22 = vld [vmem:[#allocation5 + $0x490] sm:$0xff]  ;;  %v200_v26 = vld [vmem:[#allocation5 + $0x480] sm:$0xff]  ;;  %v687_v5 = vld [vmem:[#allocation2 + $0x38] sm:$0xff] }
  0x33   :  { %343 = vmatpush.msrb.mxu0 %v208_v10  ;;  %365 = vmatpush.msrb.mxu1 %v242_v11  ;;  %v234_v27 = vld [vmem:[#allocation5 + $0x590] sm:$0xff]  ;;  %v232_v31 = vld [vmem:[#allocation5 + $0x580] sm:$0xff]  ;;  %v89_v7 = vld [vmem:[#allocation5 + $0x108] sm:$0xff] }
  0x34   :  { %389 = vmatpush.msrb.mxu2 %v81_v12  ;;  %411 = vmatpush.msrb.mxu3 %v115_v13  ;;  %v198_v30 = vld [vmem:[#allocation5 + $0x470] sm:$0xff]  ;;  %v196_v34 = vld [vmem:[#allocation5 + $0x460] sm:$0xff]  ;;  %v149_v8 = vld [vmem:[#allocation5 + $0x2e8] sm:$0xff] }
  0x35   :  { %344 = vmatpush.msrb.mxu0 %v206_v14  ;;  %366 = vmatpush.msrb.mxu1 %v240_v15  ;;  %v230_v35 = vld [vmem:[#allocation5 + $0x570] sm:$0xff]  ;;  %v228_v39 = vld [vmem:[#allocation5 + $0x560] sm:$0xff]  ;;  %v183_v9 = vld [vmem:[#allocation5 + $0x3f8] sm:$0xff] }
  0x36   :  { %390 = vmatpush.msrb.mxu2 %v79_v16  ;;  %412 = vmatpush.msrb.mxu3 %v113_v17  ;;  %v194_v38 = vld [vmem:[#allocation5 + $0x450] sm:$0xff]  ;;  %v672_v42 = vld [vmem:[#allocation2] sm:$0xff]  ;;  %v213_v10 = vld [vmem:[#allocation5 + $0x4e8] sm:$0xff] }
  0x37   :  { %345 = vmatpush.msrb.mxu0 %v204_v18  ;;  %367 = vmatpush.msrb.mxu1 %v238_v19  ;;  %v226_v43 = vld [vmem:[#allocation5 + $0x550] sm:$0xff]  ;;  %v192_v44 = vld [vmem:[#allocation5 + $0x440] sm:$0xff]  ;;  %v247_v11 = vld [vmem:[#allocation5 + $0x5f8] sm:$0xff] }
  0x38   :  { %391 = vmatpush.msrb.mxu2 %v77_v20  ;;  %413 = vmatpush.msrb.mxu3 %v111_v21  ;;  %v190_v48 = vld [vmem:[#allocation5 + $0x430] sm:$0xff]  ;;  %v224_v49 = vld [vmem:[#allocation5 + $0x540] sm:$0xff]  ;;  %v147_v12 = vld [vmem:[#allocation5 + $0x2d8] sm:$0xff] }
  0x39   :  { %346 = vmatpush.msrb.mxu0 %v202_v22  ;;  %368 = vmatpush.msrb.mxu1 %v236_v23  ;;  %v188_v52 = vld [vmem:[#allocation5 + $0x420] sm:$0xff]  ;;  %v222_v53 = vld [vmem:[#allocation5 + $0x530] sm:$0xff]  ;;  %v181_v13 = vld [vmem:[#allocation5 + $0x3e8] sm:$0xff] }
  0x3a   :  { %392 = vmatpush.msrb.mxu2 %v75_v24  ;;  %414 = vmatpush.msrb.mxu3 %v109_v25  ;;  %v678_v56 = vld [vmem:[#allocation2 + $0x10] sm:$0xff]  ;;  %v220_v58 = vld [vmem:[#allocation5 + $0x520] sm:$0xff]  ;;  %v211_v14 = vld [vmem:[#allocation5 + $0x4d8] sm:$0xff] }
  0x3b   :  { %347 = vmatpush.msrb.mxu0 %v200_v26  ;;  %369 = vmatpush.msrb.mxu1 %v234_v27  ;;  %v186_v57 = vld [vmem:[#allocation5 + $0x410] sm:$0xff]  ;;  %v184_v63 = vld [vmem:[#allocation5 + $0x400] sm:$0xff]  ;;  %v245_v15 = vld [vmem:[#allocation5 + $0x5e8] sm:$0xff] }
  0x3c   :  { %393 = vmatpush.msrb.mxu2 %v73_v28  ;;  %415 = vmatpush.msrb.mxu3 %v107_v29  ;;  %v680_v61 = vld [vmem:[#allocation2 + $0x30] sm:$0xff]  ;;  %v216_v6 = vld [vmem:[#allocation5 + $0x500] sm:$0xff]  ;;  %v145_v17 = vld [vmem:[#allocation5 + $0x2c8] sm:$0xff] }
  0x3d   :  { %348 = vmatpush.msrb.mxu0 %v198_v30  ;;  %370 = vmatpush.msrb.mxu1 %v232_v31  ;;  %v218_v0 = vld [vmem:[#allocation5 + $0x510] sm:$0xff]  ;;  %v690_v16 = vld [vmem:[#allocation2 + $0x40] sm:$0xff]  ;;  %v179_v18 = vld [vmem:[#allocation5 + $0x3d8] sm:$0xff] }
  0x3e   :  { %394 = vmatpush.msrb.mxu2 %v71_v32  ;;  %416 = vmatpush.msrb.mxu3 %v105_v33  ;;  %v209_v19 = vld [vmem:[#allocation5 + $0x4c8] sm:$0xff]  ;;  %v243_v20 = vld [vmem:[#allocation5 + $0x5d8] sm:$0xff]  ;;  %v692_v21 = vld [vmem:[#allocation2 + $0x20] sm:$0xff] }
  0x3f   :  { %349 = vmatpush.msrb.mxu0 %v196_v34  ;;  %371 = vmatpush.msrb.mxu1 %v230_v35  ;;  %v695_v22 = vld [vmem:[#allocation2 + $0x48] sm:$0xff]  ;;  %v143_v23 = vld [vmem:[#allocation5 + $0x2b8] sm:$0xff] }
  0x40   :  { %395 = vmatpush.msrb.mxu2 %v69_v36  ;;  %417 = vmatpush.msrb.mxu3 %v103_v37  ;;  %v177_v24 = vld [vmem:[#allocation5 + $0x3c8] sm:$0xff]  ;;  %v207_v25 = vld [vmem:[#allocation5 + $0x4b8] sm:$0xff] }
  0x41   :  { %350 = vmatpush.msrb.mxu0 %v194_v38  ;;  %372 = vmatpush.msrb.mxu1 %v228_v39  ;;  %v241_v26 = vld [vmem:[#allocation5 + $0x5c8] sm:$0xff]  ;;  %v175_v29 = vld [vmem:[#allocation5 + $0x3b8] sm:$0xff] }
  0x42   :  { %396 = vmatpush.msrb.mxu2 %v67_v40  ;;  %418 = vmatpush.msrb.mxu3 %v101_v41  ;;  %v698_v27 = vld [vmem:[#allocation2 + $0x28] sm:$0xff]  ;;  %v239_v31 = vld [vmem:[#allocation5 + $0x5b8] sm:$0xff]  ;;  %v702_v40 = vld [vmem:[#allocation2 + $0x50] sm:$0xff] }
  0x43   :  { %264 = vmatmul.f32.vlgmr.msra.gmra.mxu0 %v672_v42  ;;  %373 = vmatpush.msrb.mxu1 %v226_v43  ;;  %v141_v28 = vld [vmem:[#allocation5 + $0x2a8] sm:$0xff]  ;;  %v139_v32 = vld [vmem:[#allocation5 + $0x298] sm:$0xff] }
  0x44   :  { %351 = vmatpush.msrb.mxu0 %v192_v44  ;;  %397 = vmatpush.msrb.mxu2 %v65_v45  ;;  %v205_v30 = vld [vmem:[#allocation5 + $0x4a8] sm:$0xff]  ;;  %v203_v34 = vld [vmem:[#allocation5 + $0x498] sm:$0xff] }
  0x45   :  { %419 = vmatpush.msrb.mxu3 %v99_v46  ;;  %287 = vmatmul.f32.vlgmr.msra.gmra.mxu1 %v674_v47  ;;  %v173_v33 = vld [vmem:[#allocation5 + $0x3a8] sm:$0xff]  ;;  %v171_v37 = vld [vmem:[#allocation5 + $0x398] sm:$0xff] }
  0x46   :  { %352 = vmatpush.msrb.mxu0 %v190_v48  ;;  %374 = vmatpush.msrb.mxu1 %v224_v49  ;;  %v237_v35 = vld [vmem:[#allocation5 + $0x5a8] sm:$0xff]  ;;  %v235_v39 = vld [vmem:[#allocation5 + $0x598] sm:$0xff] }
  0x47   :  { %398 = vmatpush.msrb.mxu2 %v63_v50  ;;  %420 = vmatpush.msrb.mxu3 %v97_v51  ;;  %v137_v36 = vld [vmem:[#allocation5 + $0x288] sm:$0xff]  ;;  %v135_v41 = vld [vmem:[#allocation5 + $0x278] sm:$0xff] }
  0x48   :  { %353 = vmatpush.msrb.mxu0 %v188_v52  ;;  %375 = vmatpush.msrb.mxu1 %v222_v53  ;;  %v201_v38 = vld [vmem:[#allocation5 + $0x488] sm:$0xff]  ;;  %v199_v44 = vld [vmem:[#allocation5 + $0x478] sm:$0xff] }
  0x49   :  { %399 = vmatpush.msrb.mxu2 %v61_v54  ;;  %421 = vmatpush.msrb.mxu3 %v95_v55  ;;  %v169_v43 = vld [vmem:[#allocation5 + $0x388] sm:$0xff]  ;;  %v706_v46 = vld [vmem:[#allocation2 + $0x58] sm:$0xff] }
  0x4a   :  { %310 = vmatmul.f32.vlgmr.msra.gmra.mxu2 %v678_v56  ;;  %354 = vmatpush.msrb.mxu0 %v186_v57  ;;  %v233_v45 = vld [vmem:[#allocation5 + $0x588] sm:$0xff]  ;;  %v167_v49 = vld [vmem:[#allocation5 + $0x378] sm:$0xff] }
  0x4b   :  { %376 = vmatpush.msrb.mxu1 %v220_v58  ;;  %400 = vmatpush.msrb.mxu2 %v59_v59  ;;  %v133_v48 = vld [vmem:[#allocation5 + $0x268] sm:$0xff]  ;;  %v231_v51 = vld [vmem:[#allocation5 + $0x578] sm:$0xff] }
  0x4c   :  { %422 = vmatpush.msrb.mxu3 %v93_v60  ;;  %267 = vmatmul.f32.gmra.mxu0 %v680_v61  ;;  %v197_v50 = vld [vmem:[#allocation5 + $0x468] sm:$0xff]  ;;  %v131_v52 = vld [vmem:[#allocation5 + $0x258] sm:$0xff] }
  0x4d   :  { %333 = vmatmul.f32.vlgmr.msra.gmra.mxu3 %v683_v62  ;;  %355 = vmatpush.msrb.mxu0 %v184_v63  ;;  %v165_v53 = vld [vmem:[#allocation5 + $0x368] sm:$0xff]  ;;  %v227_v58 = vld [vmem:[#allocation5 + $0x558] sm:$0xff] }
  0x4e   :  { %377 = vmatpush.msrb.mxu1 %v218_v0  ;;  %401 = vmatpush.msrb.mxu2 %v57_v1  ;;  %v229_v54 = vld [vmem:[#allocation5 + $0x568] sm:$0xff]  ;;  %v127_v59 = vld [vmem:[#allocation5 + $0x238] sm:$0xff] }
  0x4f   :  { %423 = vmatpush.msrb.mxu3 %v91_v2  ;;  %432 = vmatpush.msra.mxu0 %v151_v3  ;;  %v129_v55 = vld [vmem:[#allocation5 + $0x248] sm:$0xff]  ;;  %v191_v63 = vld [vmem:[#allocation5 + $0x438] sm:$0xff] }
  0x50   :  { %478 = vmatpush.msra.mxu2 %v215_v4  ;;  %290 = vmatmul.f32.gmra.mxu1 %v687_v5  ;;  %v193_v57 = vld [vmem:[#allocation5 + $0x448] sm:$0xff]  ;;  %v159_v2 = vld [vmem:[#allocation5 + $0x338] sm:$0xff] }
  0x51   :  { %378 = vmatpush.msrb.mxu1 %v216_v6  ;;  %424 = vmatpush.msrb.mxu3 %v89_v7  ;;  %v161_v60 = vld [vmem:[#allocation5 + $0x348] sm:$0xff]  ;;  %v223_v4 = vld [vmem:[#allocation5 + $0x538] sm:$0xff] }
  0x52   :  { %433 = vmatpush.msra.mxu0 %v149_v8  ;;  %479 = vmatpush.msra.mxu2 %v213_v10  ;;  %v225_v0 = vld [vmem:[#allocation5 + $0x548] sm:$0xff]  ;;  %v123_v6 = vld [vmem:[#allocation5 + $0x218] sm:$0xff] }
  0x53   :  { %455 = vmatpush.msra.mxu1 %v183_v9  ;;  %501 = vmatpush.msra.mxu3 %v247_v11  ;;  %v125_v1 = vld [vmem:[#allocation5 + $0x228] sm:$0xff]  ;;  %v187_v8 = vld [vmem:[#allocation5 + $0x418] sm:$0xff] }
  0x54   :  { %434 = vmatpush.msra.mxu0 %v147_v12  ;;  %480 = vmatpush.msra.mxu2 %v211_v14  ;;  %v189_v3 = vld [vmem:[#allocation5 + $0x428] sm:$0xff]  ;;  %v219_v11 = vld [vmem:[#allocation5 + $0x518] sm:$0xff] }
  0x55   :  { %456 = vmatpush.msra.mxu1 %v181_v13  ;;  %502 = vmatpush.msra.mxu3 %v245_v15  ;;  %v157_v7 = vld [vmem:[#allocation5 + $0x328] sm:$0xff] }
  0x56   :  { %313 = vmatmul.f32.gmra.mxu2 %v690_v16  ;;  %435 = vmatpush.msra.mxu0 %v145_v17  ;;  %v221_v9 = vld [vmem:[#allocation5 + $0x528] sm:$0xff] }
  0x57   :  { %457 = vmatpush.msra.mxu1 %v179_v18  ;;  %481 = vmatpush.msra.mxu2 %v209_v19  ;;  %v121_v10 = vld [vmem:[#allocation5 + $0x208] sm:$0xff] }
  0x58   :  { %503 = vmatpush.msra.mxu3 %v243_v20  ;;  %356 = vmatmul.f32.vlgmr.msrb.gmra.mxu0 %v692_v21  ;;  %v153_v12 = vld [vmem:[#allocation5 + $0x308] sm:$0xff] }
  0x59   :  { %336 = vmatmul.f32.gmra.mxu3 %v695_v22  ;;  %436 = vmatpush.msra.mxu0 %v143_v23  ;;  %v217_v13 = vld [vmem:[#allocation5 + $0x508] sm:$0xff] }
  0x5a   :  { %458 = vmatpush.msra.mxu1 %v177_v24  ;;  %482 = vmatpush.msra.mxu2 %v207_v25 }
  0x5b   :  { %504 = vmatpush.msra.mxu3 %v241_v26  ;;  %379 = vmatmul.f32.vlgmr.msrb.gmra.mxu1 %v698_v27 }
  0x5c   :  { %437 = vmatpush.msra.mxu0 %v141_v28  ;;  %459 = vmatpush.msra.mxu1 %v175_v29 }
  0x5d   :  { %483 = vmatpush.msra.mxu2 %v205_v30  ;;  %505 = vmatpush.msra.mxu3 %v239_v31 }
  0x5e   :  { %438 = vmatpush.msra.mxu0 %v139_v32  ;;  %460 = vmatpush.msra.mxu1 %v173_v33 }
  0x5f   :  { %484 = vmatpush.msra.mxu2 %v203_v34  ;;  %506 = vmatpush.msra.mxu3 %v237_v35 }
  0x60   :  { %439 = vmatpush.msra.mxu0 %v137_v36  ;;  %461 = vmatpush.msra.mxu1 %v171_v37 }
  0x61   :  { %485 = vmatpush.msra.mxu2 %v201_v38  ;;  %507 = vmatpush.msra.mxu3 %v235_v39 }
  0x62   :  { %359 = vmatmul.f32.gmra.mxu0 %v702_v40  ;;  %402 = vmatmul.f32.vlgmr.msrb.gmra.mxu2 %v672_v42  ;;  %v195_v42 = vld [vmem:[#allocation5 + $0x458] sm:$0xff] }
  0x63   :  { %425 = vmatmul.f32.vlgmr.msrb.gmra.mxu3 %v674_v47  ;;  %440 = vmatpush.msra.mxu0 %v135_v41  ;;  %v163_v47 = vld [vmem:[#allocation5 + $0x358] sm:$0xff] }
  0x64   :  { %462 = vmatpush.msra.mxu1 %v169_v43  ;;  %486 = vmatpush.msra.mxu2 %v199_v44 }
  0x65   :  { %508 = vmatpush.msra.mxu3 %v233_v45  ;;  %382 = vmatmul.f32.gmra.mxu1 %v706_v46 }
  0x66   :  { %441 = vmatpush.msra.mxu0 %v133_v48  ;;  %463 = vmatpush.msra.mxu1 %v167_v49 }
  0x67   :  { %487 = vmatpush.msra.mxu2 %v197_v50  ;;  %509 = vmatpush.msra.mxu3 %v231_v51 }
  0x68   :  { %442 = vmatpush.msra.mxu0 %v131_v52  ;;  %464 = vmatpush.msra.mxu1 %v165_v53 }
  0x69   :  { %488 = vmatpush.msra.mxu2 %v195_v42  ;;  %510 = vmatpush.msra.mxu3 %v229_v54 }
  0x6a   :  { %443 = vmatpush.msra.mxu0 %v129_v55  ;;  %465 = vmatpush.msra.mxu1 %v163_v47 }
  0x6b   :  { %489 = vmatpush.msra.mxu2 %v193_v57  ;;  %511 = vmatpush.msra.mxu3 %v227_v58 }
  0x6c   :  { %405 = vmatmul.f32.gmra.mxu2 %v680_v61  ;;  %428 = vmatmul.f32.gmra.mxu3 %v687_v5  ;;  %v155_v61 = vld [vmem:[#allocation5 + $0x318] sm:$0xff]  ;;  %v185_v5 = vld [vmem:[#allocation5 + $0x408] sm:$0xff] }
  0x6d   :  { %444 = vmatpush.msra.mxu0 %v127_v59  ;;  %466 = vmatpush.msra.mxu1 %v161_v60 }
  0x6e   :  { %490 = vmatpush.msra.mxu2 %v191_v63  ;;  %512 = vmatpush.msra.mxu3 %v225_v0 }
  0x6f   :  { %445 = vmatpush.msra.mxu0 %v125_v1  ;;  %467 = vmatpush.msra.mxu1 %v159_v2 }
  0x70   :  { %491 = vmatpush.msra.mxu2 %v189_v3  ;;  %513 = vmatpush.msra.mxu3 %v223_v4 }
  0x71   :  { %446 = vmatpush.msra.mxu0 %v123_v6  ;;  %468 = vmatpush.msra.mxu1 %v157_v7 }
  0x72   :  { %492 = vmatpush.msra.mxu2 %v187_v8  ;;  %514 = vmatpush.msra.mxu3 %v221_v9 }
  0x73   :  { %447 = vmatpush.msra.mxu0 %v121_v10  ;;  %469 = vmatpush.msra.mxu1 %v155_v61 }
  0x74   :  { %493 = vmatpush.msra.mxu2 %v185_v5  ;;  %515 = vmatpush.msra.mxu3 %v219_v11 }
  0x75   :  { %448 = vmatmul.f32.vlgmr.msra.gmra.mxu0 %v678_v56  ;;  %494 = vmatmul.f32.vlgmr.msra.gmra.mxu2 %v692_v21 }
  0x76   :  { %470 = vmatpush.msra.mxu1 %v153_v12  ;;  %516 = vmatpush.msra.mxu3 %v217_v13 }
  0x77   :  { %471 = vmatmul.f32.vlgmr.msra.gmra.mxu1 %v683_v62  ;;  %517 = vmatmul.f32.vlgmr.msra.gmra.mxu3 %v698_v27 }
  0x7d   :  { %451 = vmatmul.f32.gmra.mxu0 %v690_v16  ;;  %497 = vmatmul.f32.gmra.mxu2 %v702_v40 }
  0x7f   :  { %474 = vmatmul.f32.gmra.mxu1 %v695_v22  ;;  %520 = vmatmul.f32.gmra.mxu3 %v706_v46 }
  0xc0   :  { %v265_v14 = vpop.f32.mrf.mxu0 }
  0xc2   :  { %v288_v15 = vpop.f32.mrf.mxu1 }
  0xc3   :  { %v289_v17 = vadd.f32 %v288_v15, %v265_v14 }
  0xc9   :  { %v268_v56 = vpop.f32.mrf.mxu0 }
  0xcd   :  { %v311_v18 = vpop.f32.mrf.mxu2  ;;  %v291_v19 = vpop.f32.mrf.mxu1 }
  0xce   :  { %v312_v20 = vadd.f32 %v311_v18, %v289_v17  ;;  %v292_v24 = vadd.f32 %v291_v19, %v268_v56 }
  0xd0   :  { %v334_v21 = vpop.f32.mrf.mxu3 }
  0xd1   :  { %v335_v23 = vadd.f32 %v334_v21, %v312_v20 }
  0xd5   :  { %v357_v62 = vpop.f32.mrf.mxu0 }
  0xd6   :  { %v358_v25 = vadd.f32 %v357_v62, %v335_v23 }
  0xd8   :  { %v380_v26 = vpop.f32.mrf.mxu1 }
  0xd9   :  { %v381_v16 = vadd.f32 %v380_v26, %v358_v25  ;;  %v314_v27 = vpop.f32.mrf.mxu2 }
  0xda   :  { %v315_v28 = vadd.f32 %v314_v27, %v292_v24 }
  0xdb   :  { %v524_v29 = vmax.f32 %v381_v16, 0.0 }
  0xdc   :  { %v337_v22 = vpop.f32.mrf.mxu3 }
  0xdd   :  { %v528_v30 = vmin.f32 %v524_v29, 1.0  ;;  %v338_v31 = vadd.f32 %v337_v22, %v315_v28 }
  0xdf   :  { %532 = vst [vmem:[#allocation7] sm:$0xff] %v528_v30  ;;  %v360_v32 = vpop.f32.mrf.mxu0 }
  0xe0   :  { %v361_v33 = vadd.f32 %v360_v32, %v338_v31 }
  0xe2   :  { %v383_v34 = vpop.f32.mrf.mxu1 }
  0xe3   :  { %v384_v35 = vadd.f32 %v383_v34, %v361_v33 }
  0xe5   :  { %v526_v36 = vmax.f32 %v384_v35, 0.0  ;;  %v403_v37 = vpop.f32.mrf.mxu2 }
  0xe6   :  { %v426_v39 = vpop.f32.mrf.mxu3 }
  0xe7   :  { %v530_v38 = vmin.f32 %v526_v36, 1.0  ;;  %v427_v41 = vadd.f32 %v426_v39, %v403_v37 }
  0xe9   :  { %534 = vst [vmem:[#allocation7 + $0x10] sm:$0xff] %v530_v38 }
  0xef   :  { %v406_v40 = vpop.f32.mrf.mxu2  ;;  %v429_v43 = vpop.f32.mrf.mxu3 }
  0xf0   :  { %v430_v50 = vadd.f32 %v429_v43, %v406_v40 }
  0xf2   :  { %v449_v44 = vpop.f32.mrf.mxu0 }
  0xf3   :  { %v450_v45 = vadd.f32 %v449_v44, %v427_v41 }
  0xf4   :  { %v472_v46 = vpop.f32.mrf.mxu1 }
  0xf5   :  { %v473_v48 = vadd.f32 %v472_v46, %v450_v45 }
  0xf8   :  { %v495_v49 = vpop.f32.mrf.mxu2 }
  0xf9   :  { %v496_v51 = vadd.f32 %v495_v49, %v473_v48 }
  0xfa   :  { %v452_v52 = vpop.f32.mrf.mxu0  ;;  %v518_v53 = vpop.f32.mrf.mxu3 }
  0xfb   :  { %v453_v42 = vadd.f32 %v452_v52, %v430_v50  ;;  %v519_v54 = vadd.f32 %v518_v53, %v496_v51 }
  0xfc   :  { %v475_v55 = vpop.f32.mrf.mxu1 }
  0xfd   :  { %v525_v47 = vmax.f32 %v519_v54, 0.0  ;;  %v476_v58 = vadd.f32 %v475_v55, %v453_v42 }
  0xff   :  { %v529_v57 = vmin.f32 %v525_v47, 1.0 }
 0x100   :  { %v498_v59 = vpop.f32.mrf.mxu2 }
 0x101   :  { %533 = vst [vmem:[#allocation7 + $0x8] sm:$0xff] %v529_v57  ;;  %v499_v60 = vadd.f32 %v498_v59, %v476_v58 }
 0x102   :  { %v521_v63 = vpop.f32.mrf.mxu3 }
 0x103   :  { %v522_v0 = vadd.f32 %v521_v63, %v499_v60 }
 0x105   :  { %v527_v1 = vmax.f32 %v522_v0, 0.0 }
 0x107   :  { %v531_v2 = vmin.f32 %v527_v1, 1.0 }
 0x109   :  { %535 = vst [vmem:[#allocation7 + $0x18] sm:$0xff] %v531_v2 }
 0x10a   :  { %548 = dma.vmem_to_hbm [thread:$0]  %s541_s1, 512, %s543_s25, [#allocation4], %s645_s21, %s645_s21, %s646_s22  }
 0x10b   :  { %639 = dma.done.wait [#allocation4], 512  }
 0x10c   :  { %640 = vsyncadd [#allocation4], 4294966784 }
 0x10d   :  { %553 = vsyncpa [#allocation3], 1 }
 0x10e   :  { %554 = vsyncpa [#allocation6], 1 }
 0x10f   :  { %555 = vsyncpa [#allocation4], 1 }

</bundles_post_ra>
